<compile_context>
chip_gen: v5e
topology: v5e:2x2
jax: 0.10.0
libtpu: 0.0.40
codegen_flags: <defaults>
</compile_context>

<pallas_src>
import functools

import jax
import jax.numpy as jnp
from jax import lax
from jax.experimental import pallas as pl
from jax.experimental.pallas import tpu as pltpu

STATE_DIM = 4
ACTION_DIM = 6
IN_DIM = STATE_DIM + ACTION_DIM   # 10
NODES = 200                       # default `nodes` in TrajNet.__init__
NODES_PAD = 256                   # lane-aligned hidden width (zero-padded)
OUT_DIM = STATE_DIM               # 4


def _round_up(n, m):
    return (n + m - 1) // m * m


def _mlp_kernel(x_ref, w1t_ref, b1t_ref, w2t_ref, b2t_ref, w3t_ref, b3t_ref, ot_ref):
    # x arrives in its natural (tile, IN_DIM) row-major layout (one contiguous DMA).
    # All activations are kept (features, batch) so every store is lane-dense.
    x = x_ref[...]                                               # (tile, IN_DIM) f32

    # layer 1: contract IN_DIM of both operands -> (NODES_PAD, tile) f32.
    h1 = lax.dot_general(w1t_ref[...], x, (((1,), (1,)), ((), ())),
                         preferred_element_type=jnp.float32)
    h1 = jnp.maximum(h1 + b1t_ref[...], 0.0)                     # bias + ReLU (Dropout=id)

    # layer 2: single (256,256) MXU weight, stationary while the batch streams.
    h2 = jnp.dot(w2t_ref[...], h1, preferred_element_type=jnp.float32)
    h2 = jnp.maximum(h2 + b2t_ref[...], 0.0)

    # layer 3: (OUT_DIM, 256) @ (256, tile) -> lane-dense (OUT_DIM, tile) store.
    out = jnp.dot(w3t_ref[...], h2, preferred_element_type=jnp.float32) + b3t_ref[...]
    ot_ref[...] = out.astype(ot_ref.dtype)


def pack_params(model_params):
    """One-time layout work (hoisted out of the forward path): pad hidden width
    200 -> 256 with zeros and transpose into (out_features, in_features)."""
    w1, b1, w2, b2, w3, b3 = model_params
    npad = NODES_PAD - NODES
    w1t = jnp.pad(w1, ((0, 0), (0, npad))).T.astype(jnp.float32)      # (256, 10)
    b1t = jnp.pad(b1, ((0, 0), (0, npad))).T.astype(jnp.float32)      # (256, 1)
    w2t = jnp.pad(w2, ((0, npad), (0, npad))).T.astype(jnp.float32)   # (256, 256)
    b2t = jnp.pad(b2, ((0, 0), (0, npad))).T.astype(jnp.float32)      # (256, 1)
    w3t = jnp.pad(w3, ((0, npad), (0, 0))).T.astype(jnp.float32)      # (4, 256)
    b3t = b3.T.astype(jnp.float32)                                    # (4, 1)
    return (w1t, b1t, w2t, b2t, w3t, b3t)


def time_indep_chained_latent_delta_net(x, packed_params, *, batch_tile=2048):
    """x: (B, IN_DIM) float32.  packed_params: output of pack_params().
    Returns (B, OUT_DIM) float32.

    The decoder branch of the module adds `decoder(x) * 0`, which is identically zero
    for finite activations, so it is elided entirely.
    """
    B, in_dim = x.shape
    assert in_dim == IN_DIM

    # Padding-aware tile selection: split B into the fewest tiles <= batch_tile, then
    # round each tile up to a multiple of 128 -> wasted padding < 128 rows.
    max_tile = max(128, _round_up(batch_tile, 128))
    n_steps = max(1, -(-B // max_tile))                  # ceil(B / max_tile)
    tile = _round_up(-(-B // n_steps), 128)              # ceil(B / n_steps) -> x128
    b_pad = _round_up(B, tile)

    x_pad = jnp.pad(x, ((0, b_pad - B), (0, 0))) if b_pad != B else x

    def weight_spec(p):
        # Whole-array block, constant index -> resident across the batch grid.
        return pl.BlockSpec(p.shape, lambda i: (0, 0))

    flops = 2 * b_pad * (IN_DIM * NODES_PAD + NODES_PAD * NODES_PAD + NODES_PAD * OUT_DIM)
    bytes_accessed = 4 * (b_pad * IN_DIM + sum(int(p.size) for p in packed_params)
                          + b_pad * OUT_DIM)

    grid_spec = pltpu.PrefetchScalarGridSpec(
        num_scalar_prefetch=0,
        grid=(b_pad // tile,),
        in_specs=[pl.BlockSpec((tile, IN_DIM), lambda i: (i, 0))]
                 + [weight_spec(p) for p in packed_params],
        out_specs=pl.BlockSpec((OUT_DIM, tile), lambda i: (0, i)),
    )

    out_t = pl.pallas_call(
        _mlp_kernel,
        out_shape=jax.ShapeDtypeStruct((OUT_DIM, b_pad), jnp.float32),
        grid_spec=grid_spec,
        compiler_params=pltpu.CompilerParams(
            dimension_semantics=("parallel",),
        ),
        cost_estimate=pl.CostEstimate(flops=flops, transcendentals=0,
                                      bytes_accessed=bytes_accessed),
    )(x_pad, *packed_params)

    # Slice the padded columns away BEFORE transposing back to (B, OUT_DIM).
    return out_t[:, :B].T


def _init_mlp_params(key):
    """Deterministic init of one TrajNet MLP: (10->200) ReLU (200->200) ReLU (200->4).
    Weights stored (in, out); biases stored (1, out)."""
    k1, k2, k3, k4, k5, k6 = jax.random.split(key, 6)
    s1 = 1.0 / jnp.sqrt(IN_DIM)
    s2 = 1.0 / jnp.sqrt(NODES)
    w1 = jax.random.uniform(k1, (IN_DIM, NODES), jnp.float32, -s1, s1)
    b1 = jax.random.uniform(k2, (1, NODES), jnp.float32, -s1, s1)
    w2 = jax.random.uniform(k3, (NODES, NODES), jnp.float32, -s2, s2)
    b2 = jax.random.uniform(k4, (1, NODES), jnp.float32, -s2, s2)
    w3 = jax.random.uniform(k5, (NODES, OUT_DIM), jnp.float32, -s2, s2)
    b3 = jax.random.uniform(k6, (1, OUT_DIM), jnp.float32, -s2, s2)
    return (w1, b1, w2, b2, w3, b3)


def _reference_forward(x, model_params, decoder_params):
    def mlp(p):
        w1, b1, w2, b2, w3, b3 = p
        h1 = jnp.maximum(x @ w1 + b1, 0.0)
        h2 = jnp.maximum(h1 @ w2 + b2, 0.0)
        return h2 @ w3 + b3
    return mlp(model_params) + mlp(decoder_params) * 0.0


if __name__ == "__main__":
    key = jax.random.PRNGKey(0)
    k_x, k_model, k_dec = jax.random.split(key, 3)

    model_params = _init_mlp_params(k_model)
    decoder_params = _init_mlp_params(k_dec)   # interface parity only; decoder(x)*0 elided

    packed = pack_params(model_params)         # one-time layout work, off the hot path

    fwd = jax.jit(functools.partial(time_indep_chained_latent_delta_net, batch_tile=2048))

    # B=50 exercises batch padding / tail slicing; B=640 exercises a non-tile-aligned
    # batch with padding-aware tile selection.
    for B in (50, 640):
        xb = jax.random.normal(jax.random.fold_in(k_x, B), (B, IN_DIM), jnp.float32)
        out = jax.block_until_ready(fwd(xb, packed))
        ref = _reference_forward(xb, model_params, decoder_params)
        assert out.shape == (B, OUT_DIM)
        assert jnp.allclose(out, ref, atol=2e-2, rtol=2e-2), float(
            jnp.max(jnp.abs(out - ref)))

    print("KERNEL_OK")
</pallas_src>

<mosaic_0001>
module attributes {stable_mosaic.version = 11 : i64} {
  func.func @_mlp_kernel(%arg0: i32, %arg1: memref<128x10xf32, #tpu.memory_space<vmem>>, %arg2: memref<256x10xf32, #tpu.memory_space<vmem>>, %arg3: memref<256x1xf32, #tpu.memory_space<vmem>>, %arg4: memref<256x256xf32, #tpu.memory_space<vmem>>, %arg5: memref<256x1xf32, #tpu.memory_space<vmem>>, %arg6: memref<4x256xf32, #tpu.memory_space<vmem>>, %arg7: memref<4x1xf32, #tpu.memory_space<vmem>>, %arg8: memref<4x128xf32, #tpu.memory_space<vmem>>) attributes {dimension_semantics = [#tpu.dimension_semantics<parallel>], iteration_bounds = array<i64: 1>, scalar_prefetch = 0 : i64, scratch_operands = 0 : i64, tpu.core_type = #tpu.core_type<tc>, window_params = [{transform_indices = @transform_0, window_bounds = array<i64: 128, 10>}, {pipeline_mode = #tpu.pipeline_mode<synchronous>, transform_indices = @transform_1, window_bounds = array<i64: 256, 10>}, {pipeline_mode = #tpu.pipeline_mode<synchronous>, transform_indices = @transform_2, window_bounds = array<i64: 256, 1>}, {pipeline_mode = #tpu.pipeline_mode<synchronous>, transform_indices = @transform_3, window_bounds = array<i64: 256, 256>}, {pipeline_mode = #tpu.pipeline_mode<synchronous>, transform_indices = @transform_4, window_bounds = array<i64: 256, 1>}, {pipeline_mode = #tpu.pipeline_mode<synchronous>, transform_indices = @transform_5, window_bounds = array<i64: 4, 256>}, {pipeline_mode = #tpu.pipeline_mode<synchronous>, transform_indices = @transform_6, window_bounds = array<i64: 4, 1>}, {transform_indices = @transform_7, window_bounds = array<i64: 4, 128>}]} {
    %c0 = arith.constant 0 : index
    %c0_0 = arith.constant 0 : index
    %0 = vector.load %arg1[%c0, %c0_0] : memref<128x10xf32, #tpu.memory_space<vmem>>, vector<128x10xf32>
    %c0_1 = arith.constant 0 : index
    %c0_2 = arith.constant 0 : index
    %1 = vector.load %arg2[%c0_1, %c0_2] : memref<256x10xf32, #tpu.memory_space<vmem>>, vector<256x10xf32>
    %cst = arith.constant dense<0.000000e+00> : vector<256x128xf32>
    %2 = tpu.matmul %1, %0, %cst {dimension_numbers = #tpu.dot_dimension_numbers<[1], [1], [0], [0], [0, 0, 1, 0], [], []>} : vector<256x10xf32>, vector<128x10xf32>, vector<256x128xf32> -> vector<256x128xf32>
    %c0_3 = arith.constant 0 : index
    %c0_4 = arith.constant 0 : index
    %3 = vector.load %arg3[%c0_3, %c0_4] : memref<256x1xf32, #tpu.memory_space<vmem>>, vector<256x1xf32>
    %4 = vector.broadcast %3 : vector<256x1xf32> to vector<256x128xf32>
    %5 = arith.addf %2, %4 : vector<256x128xf32>
    %cst_5 = arith.constant 0.000000e+00 : f32
    %6 = vector.broadcast %cst_5 : f32 to vector<256x128xf32>
    %7 = arith.maximumf %5, %6 : vector<256x128xf32>
    %c0_6 = arith.constant 0 : index
    %c0_7 = arith.constant 0 : index
    %8 = vector.load %arg4[%c0_6, %c0_7] : memref<256x256xf32, #tpu.memory_space<vmem>>, vector<256x256xf32>
    %cst_8 = arith.constant dense<0.000000e+00> : vector<256x128xf32>
    %9 = tpu.matmul %8, %7, %cst_8 {dimension_numbers = #tpu.dot_dimension_numbers<[1], [0], [0], [1], [0, 0, 1, 1], [], []>} : vector<256x256xf32>, vector<256x128xf32>, vector<256x128xf32> -> vector<256x128xf32>
    %c0_9 = arith.constant 0 : index
    %c0_10 = arith.constant 0 : index
    %10 = vector.load %arg5[%c0_9, %c0_10] : memref<256x1xf32, #tpu.memory_space<vmem>>, vector<256x1xf32>
    %11 = vector.broadcast %10 : vector<256x1xf32> to vector<256x128xf32>
    %12 = arith.addf %9, %11 : vector<256x128xf32>
    %cst_11 = arith.constant 0.000000e+00 : f32
    %13 = vector.broadcast %cst_11 : f32 to vector<256x128xf32>
    %14 = arith.maximumf %12, %13 : vector<256x128xf32>
    %c0_12 = arith.constant 0 : index
    %c0_13 = arith.constant 0 : index
    %15 = vector.load %arg6[%c0_12, %c0_13] : memref<4x256xf32, #tpu.memory_space<vmem>>, vector<4x256xf32>
    %cst_14 = arith.constant dense<0.000000e+00> : vector<4x128xf32>
    %16 = tpu.matmul %15, %14, %cst_14 {dimension_numbers = #tpu.dot_dimension_numbers<[1], [0], [0], [1], [0, 0, 1, 1], [], []>} : vector<4x256xf32>, vector<256x128xf32>, vector<4x128xf32> -> vector<4x128xf32>
    %c0_15 = arith.constant 0 : index
    %c0_16 = arith.constant 0 : index
    %17 = vector.load %arg7[%c0_15, %c0_16] : memref<4x1xf32, #tpu.memory_space<vmem>>, vector<4x1xf32>
    %18 = vector.broadcast %17 : vector<4x1xf32> to vector<4x128xf32>
    %19 = arith.addf %16, %18 : vector<4x128xf32>
    %c0_17 = arith.constant 0 : index
    %c0_18 = arith.constant 0 : index
    %20 = vector.load %arg8[%c0_17, %c0_18] : memref<4x128xf32, #tpu.memory_space<vmem>>, vector<4x128xf32>
    tpu.vector_store %arg8[%c0_17, %c0_18], %19 {strides = array<i32>} : memref<4x128xf32, #tpu.memory_space<vmem>>, vector<4x128xf32>,
    return
  }
  func.func @transform_0(%arg0: i32) -> (i32, i32) {
    %c0_i32 = arith.constant 0 : i32
    %c0_i32_0 = arith.constant 0 : i32
    return %arg0, %c0_i32 : i32, i32
  }
  func.func @transform_1(%arg0: i32) -> (i32, i32) {
    %c0_i32 = arith.constant 0 : i32
    %c0_i32_0 = arith.constant 0 : i32
    %c0_i32_1 = arith.constant 0 : i32
    return %c0_i32, %c0_i32_0 : i32, i32
  }
  func.func @transform_2(%arg0: i32) -> (i32, i32) {
    %c0_i32 = arith.constant 0 : i32
    %c0_i32_0 = arith.constant 0 : i32
    %c0_i32_1 = arith.constant 0 : i32
    return %c0_i32, %c0_i32_0 : i32, i32
  }
  func.func @transform_3(%arg0: i32) -> (i32, i32) {
    %c0_i32 = arith.constant 0 : i32
    %c0_i32_0 = arith.constant 0 : i32
    %c0_i32_1 = arith.constant 0 : i32
    return %c0_i32, %c0_i32_0 : i32, i32
  }
  func.func @transform_4(%arg0: i32) -> (i32, i32) {
    %c0_i32 = arith.constant 0 : i32
    %c0_i32_0 = arith.constant 0 : i32
    %c0_i32_1 = arith.constant 0 : i32
    return %c0_i32, %c0_i32_0 : i32, i32
  }
  func.func @transform_5(%arg0: i32) -> (i32, i32) {
    %c0_i32 = arith.constant 0 : i32
    %c0_i32_0 = arith.constant 0 : i32
    %c0_i32_1 = arith.constant 0 : i32
    return %c0_i32, %c0_i32_0 : i32, i32
  }
  func.func @transform_6(%arg0: i32) -> (i32, i32) {
    %c0_i32 = arith.constant 0 : i32
    %c0_i32_0 = arith.constant 0 : i32
    %c0_i32_1 = arith.constant 0 : i32
    return %c0_i32, %c0_i32_0 : i32, i32
  }
  func.func @transform_7(%arg0: i32) -> (i32, i32) {
    %c0_i32 = arith.constant 0 : i32
    %c0_i32_0 = arith.constant 0 : i32
    return %c0_i32, %arg0 : i32, i32
  }
}

</mosaic_0001>

<bundles_post_ra>
// kernel: time_indep_chained_latent_delta_net.1
= control target key start
LH: loop header
LB: loop body
LE: loop exit
PB: predicated region body
PF: predicated region fallthrough
CT: control target
= control target key end

     0   :  { %vm266_vm0 = vcmask 80896   ;;  %v1228_v0 = vmov 0   ;;  %s2127_s2 = inlined_call_operand.vmem [shape: f32[256,1], index: 2, kind: input, shape index: {}]   ;;  %s2128_s0 = inlined_call_operand.vmem [shape: f32[128,10], index: 0, kind: input, shape index: {}]   ;;  %s2129_s1 = inlined_call_operand.vmem [shape: f32[256,10], index: 1, kind: input, shape index: {}]   ;;  %s2130_s4 = inlined_call_operand.vmem [shape: f32[256,1], index: 4, kind: input, shape index: {}]   ;;  %s2131_s6 = inlined_call_operand.vmem [shape: f32[4,1], index: 6, kind: input, shape index: {}]   ;;  %s2132_s3 = inlined_call_operand.vmem [shape: f32[256,256], index: 3, kind: input, shape index: {}]   ;;  %s2133_s5 = inlined_call_operand.vmem [shape: f32[4,256], index: 5, kind: input, shape index: {}]   ;;  %s2134_s7 = inlined_call_operand.vmem [shape: f32[4,128], index: 7, kind: output, shape index: {}]  }
   0x1   :  { %1226 = vset.pattern.permute.xlu1 %v1228_v0  ;;  %v89_v1 = vld [vmem:[%s2127_s2 + $0x78] sm:$0xff]  ;;  %1225 = vset.pattern.permute.xlu0 %v1228_v0  ;;  %v40_v4 = vld [vmem:[%s2128_s0 + $0x70] sm:$0xff]  ;;  %v103_v5 = vld [vmem:[%s2127_s2 + $0xe8] sm:$0xff] }
   0x2   :  { %v41_v2 = vld [vmem:[%s2128_s0 + $0x78] sm:$0xff]  ;;  %183 = vperm.xlu1 %1226, %v89_v1   ;;  %1227 = vset.pattern.permute.xlu2 %v1228_v0  ;;  %v39_v6 = vld [vmem:[%s2128_s0 + $0x68] sm:$0xff]  ;;  %v104_v7 = vld [vmem:[%s2127_s2 + $0xf0] sm:$0xff] }
   0x3   :  { %v105_v3 = vld [vmem:[%s2127_s2 + $0xf8] sm:$0xff]  ;;  %1128 = vmatpush.xpose.msk.msra.mxu0 %vm266_vm0, %v41_v2  ;;  %1176 = vmatpush.xpose.msk.msra.mxu3 %vm266_vm0, %v41_v2  ;;  %v38_v8 = vld [vmem:[%s2128_s0 + $0x60] sm:$0xff]  ;;  %v87_v11 = vld [vmem:[%s2127_s2 + $0x68] sm:$0xff] }
   0x4   :  { %263 = vperm.xlu0 %1225, %v105_v3   ;;  %v101_v9 = vld [vmem:[%s2127_s2 + $0xd8] sm:$0xff]  ;;  %v36_v12 = vld [vmem:[%s2128_s0 + $0x50] sm:$0xff]  ;;  %v35_v14 = vld [vmem:[%s2128_s0 + $0x48] sm:$0xff] }
   0x5   :  { %v37_v10 = vld [vmem:[%s2128_s0 + $0x58] sm:$0xff]  ;;  %v100_v15 = vld [vmem:[%s2127_s2 + $0xd0] sm:$0xff]  ;;  %v34_v17 = vld [vmem:[%s2128_s0 + $0x40] sm:$0xff] }
   0x6   :  { %v85_v13 = vld [vmem:[%s2127_s2 + $0x58] sm:$0xff]  ;;  %v88_v16 = vld [vmem:[%s2127_s2 + $0x70] sm:$0xff]  ;;  %v98_v18 = vld [vmem:[%s2127_s2 + $0xc0] sm:$0xff] }
   0x7   :  { %1129 = vmatpush.xpose.msk.msra.mxu0 %vm266_vm0, %v40_v4  ;;  %1177 = vmatpush.xpose.msk.msra.mxu3 %vm266_vm0, %v40_v4  ;;  %v33_v19 = vld [vmem:[%s2128_s0 + $0x38] sm:$0xff]  ;;  %v84_v20 = vld [vmem:[%s2127_s2 + $0x50] sm:$0xff]  ;;  %v102_v21 = vld [vmem:[%s2127_s2 + $0xe0] sm:$0xff] }
   0x8   :  { %178 = vperm.xlu2 %1227, %v88_v16   ;;  %v32_v22 = vld [vmem:[%s2128_s0 + $0x30] sm:$0xff]  ;;  %v82_v23 = vld [vmem:[%s2127_s2 + $0x40] sm:$0xff]  ;;  %v31_v24 = vld [vmem:[%s2128_s0 + $0x28] sm:$0xff] }
   0x9   :  { %v97_v25 = vld [vmem:[%s2127_s2 + $0xb8] sm:$0xff]  ;;  %v86_v26 = vld [vmem:[%s2127_s2 + $0x60] sm:$0xff]  ;;  %v95_v28 = vld [vmem:[%s2127_s2 + $0xa8] sm:$0xff] }
   0xa   :  { %253 = vperm.xlu1 %1226, %v103_v5   ;;  %v30_v27 = vld [vmem:[%s2128_s0 + $0x20] sm:$0xff]  ;;  %v29_v29 = vld [vmem:[%s2128_s0 + $0x18] sm:$0xff]  ;;  %v99_v31 = vld [vmem:[%s2127_s2 + $0xc8] sm:$0xff] }
   0xb   :  { %1130 = vmatpush.xpose.msk.msra.mxu0 %vm266_vm0, %v39_v6  ;;  %1178 = vmatpush.xpose.msk.msra.mxu3 %vm266_vm0, %v39_v6  ;;  %v81_v30 = vld [vmem:[%s2127_s2 + $0x38] sm:$0xff]  ;;  %v28_v32 = vld [vmem:[%s2128_s0 + $0x10] sm:$0xff]  ;;  %v79_v33 = vld [vmem:[%s2127_s2 + $0x28] sm:$0xff] }
   0xc   :  { %258 = vperm.xlu0 %1225, %v104_v7   ;;  %v27_v34 = vld [vmem:[%s2128_s0 + $0x8] sm:$0xff]  ;;  %v94_v35 = vld [vmem:[%s2127_s2 + $0xa0] sm:$0xff]  ;;  %v92_v39 = vld [vmem:[%s2127_s2 + $0x90] sm:$0xff] }
   0xd   :  { %v83_v36 = vld [vmem:[%s2127_s2 + $0x48] sm:$0xff]  ;;  %v26_v37 = vld [vmem:[%s2128_s0] sm:$0xff]  ;;  %v96_v41 = vld [vmem:[%s2127_s2 + $0xb0] sm:$0xff] }
   0xe   :  { %v42_v38 = vld [vmem:[%s2129_s1] sm:$0xff]  ;;  %v43_v43 = vld [vmem:[%s2129_s1 + $0x8] sm:$0xff]  ;;  %v76_v44 = vld [vmem:[%s2127_s2 + $0x10] sm:$0xff] }
   0xf   :  { %1131 = vmatpush.xpose.msk.msra.mxu0 %vm266_vm0, %v38_v8  ;;  %1179 = vmatpush.xpose.msk.msra.mxu3 %vm266_vm0, %v38_v8  ;;  %v78_v40 = vld [vmem:[%s2127_s2 + $0x20] sm:$0xff]  ;;  %v91_v45 = vld [vmem:[%s2127_s2 + $0x88] sm:$0xff]  ;;  %v80_v46 = vld [vmem:[%s2127_s2 + $0x30] sm:$0xff] }
  0x10   :  { %248 = vperm.xlu2 %1227, %v102_v21   ;;  %v66_v42 = vld [vmem:[%s2129_s1 + $0xc0] sm:$0xff]  ;;  %v67_v47 = vld [vmem:[%s2129_s1 + $0xc8] sm:$0xff]  ;;  %v44_v48 = vld [vmem:[%s2129_s1 + $0x10] sm:$0xff] }
  0x11   :  { %v74_v49 = vld [vmem:[%s2127_s2] sm:$0xff]  ;;  %v75_v50 = vld [vmem:[%s2127_s2 + $0x8] sm:$0xff]  ;;  %v93_v51 = vld [vmem:[%s2127_s2 + $0x98] sm:$0xff] }
  0x12   :  { %243 = vperm.xlu1 %1226, %v101_v9   ;;  %v68_v52 = vld [vmem:[%s2129_s1 + $0xd0] sm:$0xff]  ;;  %v45_v53 = vld [vmem:[%s2129_s1 + $0x18] sm:$0xff]  ;;  %v633_v54 = vld [vmem:[%s2130_s4 + $0x68] sm:$0xff] }
  0x13   :  { %1132 = vmatpush.xpose.msk.msra.mxu0 %vm266_vm0, %v37_v10  ;;  %1180 = vmatpush.xpose.msk.msra.mxu3 %vm266_vm0, %v37_v10  ;;  %v634_v55 = vld [vmem:[%s2130_s4 + $0x70] sm:$0xff]  ;;  %v77_v56 = vld [vmem:[%s2127_s2 + $0x18] sm:$0xff]  ;;  %v46_v58 = vld [vmem:[%s2129_s1 + $0x20] sm:$0xff] }
  0x14   :  { %173 = vperm.xlu0 %1225, %v87_v11   ;;  %v69_v57 = vld [vmem:[%s2129_s1 + $0xd8] sm:$0xff]  ;;  %v70_v61 = vld [vmem:[%s2129_s1 + $0xe0] sm:$0xff]  ;;  %v47_v62 = vld [vmem:[%s2129_s1 + $0x28] sm:$0xff] }
  0x15   :  { %v651_v59 = vld [vmem:[%s2130_s4 + $0xf8] sm:$0xff]  ;;  %v629_v63 = vld [vmem:[%s2130_s4 + $0x48] sm:$0xff]  ;;  %v650_v0 = vld [vmem:[%s2130_s4 + $0xf0] sm:$0xff] }
  0x16   :  { %v631_v60 = vld [vmem:[%s2130_s4 + $0x58] sm:$0xff]  ;;  %v90_v1 = vld [vmem:[%s2127_s2 + $0x80] sm:$0xff]  ;;  %v71_v2 = vld [vmem:[%s2129_s1 + $0xe8] sm:$0xff] }
  0x17   :  { %1133 = vmatpush.xpose.msk.msra.mxu0 %vm266_vm0, %v36_v12  ;;  %1181 = vmatpush.xpose.msk.msra.mxu3 %vm266_vm0, %v36_v12  ;;  %v48_v3 = vld [vmem:[%s2129_s1 + $0x30] sm:$0xff]  ;;  %v648_v4 = vld [vmem:[%s2130_s4 + $0xe0] sm:$0xff]  ;;  %v635_v6 = vld [vmem:[%s2130_s4 + $0x78] sm:$0xff] }
  0x18   :  { %168 = vperm.xlu2 %1227, %v86_v26   ;;  %v628_v5 = vld [vmem:[%s2130_s4 + $0x40] sm:$0xff]  ;;  %v72_v7 = vld [vmem:[%s2129_s1 + $0xf0] sm:$0xff]  ;;  %v49_v8 = vld [vmem:[%s2129_s1 + $0x38] sm:$0xff] }
  0x19   :  { %v626_v9 = vld [vmem:[%s2130_s4 + $0x30] sm:$0xff]  ;;  %v647_v10 = vld [vmem:[%s2130_s4 + $0xd8] sm:$0xff]  ;;  %v632_v11 = vld [vmem:[%s2130_s4 + $0x60] sm:$0xff] }
  0x1a   :  { %163 = vperm.xlu1 %1226, %v85_v13   ;;  %v73_v12 = vld [vmem:[%s2129_s1 + $0xf8] sm:$0xff]  ;;  %v50_v13 = vld [vmem:[%s2129_s1 + $0x40] sm:$0xff]  ;;  %v630_v16 = vld [vmem:[%s2130_s4 + $0x50] sm:$0xff] }
  0x1b   :  { %1134 = vmatpush.xpose.msk.msra.mxu0 %vm266_vm0, %v35_v14  ;;  %1182 = vmatpush.xpose.msk.msra.mxu3 %vm266_vm0, %v35_v14  ;;  %v645_v14 = vld [vmem:[%s2130_s4 + $0xc8] sm:$0xff]  ;;  %v52_v21 = vld [vmem:[%s2129_s1 + $0x50] sm:$0xff]  ;;  %v620_v26 = vld [vmem:[%s2130_s4] sm:$0xff] }
  0x1c   :  { %238 = vperm.xlu0 %1225, %v100_v15   ;;  %v625_v15 = vld [vmem:[%s2130_s4 + $0x28] sm:$0xff] }
  0x1f   :  { %1135 = vmatpush.xpose.msk.msra.mxu0 %vm266_vm0, %v34_v17  ;;  %1183 = vmatpush.xpose.msk.msra.mxu3 %vm266_vm0, %v34_v17  ;;  %v51_v17 = vld [vmem:[%s2129_s1 + $0x48] sm:$0xff] }
  0x20   :  { %233 = vperm.xlu2 %1227, %v99_v31   ;;  %v639_v31 = vld [vmem:[%s2130_s4 + $0x98] sm:$0xff] }
  0x22   :  { %228 = vperm.xlu1 %1226, %v98_v18   ;;  %v623_v18 = vld [vmem:[%s2130_s4 + $0x18] sm:$0xff] }
  0x23   :  { %1136 = vmatpush.xpose.msk.msra.mxu0 %vm266_vm0, %v33_v19  ;;  %1184 = vmatpush.xpose.msk.msra.mxu3 %vm266_vm0, %v33_v19  ;;  %v644_v19 = vld [vmem:[%s2130_s4 + $0xc0] sm:$0xff] }
  0x24   :  { %158 = vperm.xlu0 %1225, %v84_v20   ;;  %v649_v20 = vld [vmem:[%s2130_s4 + $0xe8] sm:$0xff] }
  0x27   :  { %1137 = vmatpush.xpose.msk.msra.mxu0 %vm266_vm0, %v32_v22  ;;  %1185 = vmatpush.xpose.msk.msra.mxu3 %vm266_vm0, %v32_v22  ;;  %v642_v22 = vld [vmem:[%s2130_s4 + $0xb0] sm:$0xff] }
  0x28   :  { %153 = vperm.xlu2 %1227, %v83_v36   ;;  %v643_v36 = vld [vmem:[%s2130_s4 + $0xb8] sm:$0xff] }
  0x2a   :  { %148 = vperm.xlu1 %1226, %v82_v23   ;;  %v622_v23 = vld [vmem:[%s2130_s4 + $0x10] sm:$0xff] }
  0x2b   :  { %1138 = vmatpush.xpose.msk.msra.mxu0 %vm266_vm0, %v31_v24  ;;  %1186 = vmatpush.xpose.msk.msra.mxu3 %vm266_vm0, %v31_v24  ;;  %v627_v24 = vld [vmem:[%s2130_s4 + $0x38] sm:$0xff] }
  0x2c   :  { %223 = vperm.xlu0 %1225, %v97_v25   ;;  %v53_v25 = vld [vmem:[%s2129_s1 + $0x58] sm:$0xff] }
  0x2f   :  { %1139 = vmatpush.xpose.msk.msra.mxu0 %vm266_vm0, %v30_v27  ;;  %1187 = vmatpush.xpose.msk.msra.mxu3 %vm266_vm0, %v30_v27  ;;  %v641_v27 = vld [vmem:[%s2130_s4 + $0xa8] sm:$0xff] }
  0x30   :  { %218 = vperm.xlu2 %1227, %v96_v41  }
  0x32   :  { %213 = vperm.xlu1 %1226, %v95_v28   ;;  %v646_v28 = vld [vmem:[%s2130_s4 + $0xd0] sm:$0xff] }
  0x33   :  { %1140 = vmatpush.xpose.msk.msra.mxu0 %vm266_vm0, %v29_v29  ;;  %1188 = vmatpush.xpose.msk.msra.mxu3 %vm266_vm0, %v29_v29  ;;  %v54_v29 = vld [vmem:[%s2129_s1 + $0x60] sm:$0xff] }
  0x34   :  { %143 = vperm.xlu0 %1225, %v81_v30   ;;  %v638_v30 = vld [vmem:[%s2130_s4 + $0x90] sm:$0xff] }
  0x37   :  { %1141 = vmatpush.xpose.msk.msra.mxu0 %vm266_vm0, %v28_v32  ;;  %1189 = vmatpush.xpose.msk.msra.mxu3 %vm266_vm0, %v28_v32  ;;  %v624_v32 = vld [vmem:[%s2130_s4 + $0x20] sm:$0xff] }
  0x38   :  { %138 = vperm.xlu2 %1227, %v80_v46  }
  0x3a   :  { %133 = vperm.xlu1 %1226, %v79_v33   ;;  %v55_v33 = vld [vmem:[%s2129_s1 + $0x68] sm:$0xff] }
  0x3b   :  { %1142 = vmatpush.xpose.msk.msra.mxu0 %vm266_vm0, %v27_v34  ;;  %1190 = vmatpush.xpose.msk.msra.mxu3 %vm266_vm0, %v27_v34  ;;  %v1071_v34 = vld [vmem:[%s2131_s6] sm:$0xf] }
  0x3c   :  { %208 = vperm.xlu0 %1225, %v94_v35   ;;  %v636_v35 = vld [vmem:[%s2130_s4 + $0x80] sm:$0xff] }
  0x3f   :  { %1143 = vmatpush.xpose.msk.msra.mxu0 %vm266_vm0, %v26_v37  ;;  %1191 = vmatpush.xpose.msk.msra.mxu3 %vm266_vm0, %v26_v37  ;;  %v56_v37 = vld [vmem:[%s2129_s1 + $0x70] sm:$0xff] }
  0x40   :  { %203 = vperm.xlu2 %1227, %v93_v51   ;;  %v61_v51 = vld [vmem:[%s2129_s1 + $0x98] sm:$0xff] }
  0x42   :  { %1144 = vmatmul.msk.f32.vlgmr.msra.gmra.mxu0 %vm266_vm0, %v42_v38  ;;  %198 = vperm.xlu1 %1226, %v92_v39   ;;  %v621_v38 = vld [vmem:[%s2130_s4 + $0x8] sm:$0xff]  ;;  %v57_v39 = vld [vmem:[%s2129_s1 + $0x78] sm:$0xff] }
  0x43   :  { %1168 = vmatmul.msk.f32.vlgmr.msra.gmra.mxu3 %vm266_vm0, %v66_v42  ;;  %v58_v42 = vld [vmem:[%s2129_s1 + $0x80] sm:$0xff] }
  0x44   :  { %128 = vperm.xlu0 %1225, %v78_v40   ;;  %v640_v40 = vld [vmem:[%s2130_s4 + $0xa0] sm:$0xff] }
  0x48   :  { %123 = vperm.xlu2 %1227, %v77_v56  }
  0x4a   :  { %1145 = vmatmul.msk.f32.gmra.mxu0 %vm266_vm0, %v43_v43  ;;  %118 = vperm.xlu1 %1226, %v76_v44   ;;  %v637_v43 = vld [vmem:[%s2130_s4 + $0x88] sm:$0xff] }
  0x4b   :  { %1169 = vmatmul.msk.f32.gmra.mxu3 %vm266_vm0, %v67_v47 }
  0x4c   :  { %193 = vperm.xlu0 %1225, %v91_v45   ;;  %v59_v45 = vld [vmem:[%s2129_s1 + $0x88] sm:$0xff] }
  0x50   :  { %188 = vperm.xlu2 %1227, %v90_v1  }
  0x52   :  { %1146 = vmatmul.msk.f32.gmra.mxu0 %vm266_vm0, %v44_v48  ;;  %108 = vperm.xlu1 %1226, %v74_v49   ;;  %v60_v48 = vld [vmem:[%s2129_s1 + $0x90] sm:$0xff] }
  0x53   :  { %1170 = vmatmul.msk.f32.gmra.mxu3 %vm266_vm0, %v68_v52 }
  0x54   :  { %113 = vperm.xlu0 %1225, %v75_v50  }
  0x58   :  { %729 = vperm.xlu2 %1227, %v635_v6   ;;  %v65_v6 = vld [vmem:[%s2129_s1 + $0xb8] sm:$0xff] }
  0x5a   :  { %1147 = vmatmul.msk.f32.gmra.mxu0 %vm266_vm0, %v45_v53  ;;  %719 = vperm.xlu1 %1226, %v633_v54   ;;  %v62_v54 = vld [vmem:[%s2129_s1 + $0xa0] sm:$0xff] }
  0x5b   :  { %1171 = vmatmul.msk.f32.gmra.mxu3 %vm266_vm0, %v69_v57 }
  0x5c   :  { %724 = vperm.xlu0 %1225, %v634_v55  }
  0x60   :  { %714 = vperm.xlu2 %1227, %v632_v11  }
  0x62   :  { %1148 = vmatmul.msk.f32.gmra.mxu0 %vm266_vm0, %v46_v58  ;;  %809 = vperm.xlu1 %1226, %v651_v59   ;;  %v63_v58 = vld [vmem:[%s2129_s1 + $0xa8] sm:$0xff] }
  0x63   :  { %1172 = vmatmul.msk.f32.gmra.mxu3 %vm266_vm0, %v70_v61  ;;  %v179_v61 = vpop.permute.xlu2 %178 }
  0x64   :  { %709 = vperm.xlu0 %1225, %v631_v60  }
  0x68   :  { %704 = vperm.xlu2 %1227, %v630_v16  }
  0x6a   :  { %1149 = vmatmul.msk.f32.gmra.mxu0 %vm266_vm0, %v47_v62  ;;  %699 = vperm.xlu1 %1226, %v629_v63  }
  0x6b   :  { %1173 = vmatmul.msk.f32.gmra.mxu3 %vm266_vm0, %v71_v2 }
  0x6c   :  { %804 = vperm.xlu0 %1225, %v650_v0   ;;  %v64_v0 = vld [vmem:[%s2129_s1 + $0xb0] sm:$0xff] }
  0x70   :  { %799 = vperm.xlu2 %1227, %v649_v20  }
  0x72   :  { %1150 = vmatmul.msk.f32.gmra.mxu0 %vm266_vm0, %v48_v3  ;;  %794 = vperm.xlu1 %1226, %v648_v4   ;;  %v249_v3 = vpop.permute.xlu2 %248 }
  0x73   :  { %1174 = vmatmul.msk.f32.gmra.mxu3 %vm266_vm0, %v72_v7 }
  0x74   :  { %694 = vperm.xlu0 %1225, %v628_v5   ;;  %v1670_v56 = vpop.permute.xlu1 %183 }
  0x76   :  { %v264_v59 = vpop.permute.xlu0 %263 }
  0x78   :  { %689 = vperm.xlu2 %1227, %v627_v24  }
  0x7a   :  { %1151 = vmatmul.msk.f32.gmra.mxu0 %vm266_vm0, %v49_v8  ;;  %684 = vperm.xlu1 %1226, %v626_v9   ;;  %v169_v9 = vpop.permute.xlu2 %168 }
  0x7b   :  { %1175 = vmatmul.msk.f32.gmra.mxu3 %vm266_vm0, %v73_v12 }
  0x7c   :  { %789 = vperm.xlu0 %1225, %v647_v10   ;;  %v254_v62 = vpop.permute.xlu1 %253 }
  0x7e   :  { %v259_v2 = vpop.permute.xlu0 %258 }
  0x80   :  { %784 = vperm.xlu2 %1227, %v646_v28  }
  0x82   :  { %1152 = vmatmul.msk.f32.gmra.mxu0 %vm266_vm0, %v50_v13  ;;  %779 = vperm.xlu1 %1226, %v645_v14  }
  0x84   :  { %679 = vperm.xlu0 %1225, %v625_v15   ;;  %v244_v4 = vpop.permute.xlu1 %243 }
  0x86   :  { %v174_v8 = vpop.permute.xlu0 %173 }
  0x88   :  { %674 = vperm.xlu2 %1227, %v624_v32  }
  0x8a   :  { %1153 = vmatmul.msk.f32.gmra.mxu0 %vm266_vm0, %v51_v17  ;;  %669 = vperm.xlu1 %1226, %v623_v18  }
  0x8c   :  { %774 = vperm.xlu0 %1225, %v644_v19   ;;  %v164_v12 = vpop.permute.xlu1 %163 }
  0x90   :  { %769 = vperm.xlu2 %1227, %v643_v36  }
  0x92   :  { %1154 = vmatmul.msk.f32.gmra.mxu0 %vm266_vm0, %v52_v21  ;;  %764 = vperm.xlu1 %1226, %v642_v22   ;;  %v239_v21 = vpop.permute.xlu0 %238 }
  0x94   :  { %664 = vperm.xlu0 %1225, %v622_v23   ;;  %v229_v28 = vpop.permute.xlu1 %228 }
  0x98   :  { %659 = vperm.xlu2 %1227, %v621_v38  }
  0x9a   :  { %1155 = vmatmul.msk.f32.gmra.mxu0 %vm266_vm0, %v53_v25  ;;  %654 = vperm.xlu1 %1226, %v620_v26   ;;  %v234_v25 = vpop.permute.xlu2 %233 }
  0x9c   :  { %759 = vperm.xlu0 %1225, %v641_v27  }
  0xa0   :  { %754 = vperm.xlu2 %1227, %v640_v40  }
  0xa2   :  { %1156 = vmatmul.msk.f32.gmra.mxu0 %vm266_vm0, %v54_v29  ;;  %744 = vperm.xlu1 %1226, %v638_v30  }
  0xa4   :  { %749 = vperm.xlu0 %1225, %v639_v31  }
  0xa8   :  { %739 = vperm.xlu2 %1227, %v637_v43  }
  0xaa   :  { %1157 = vmatmul.msk.f32.gmra.mxu0 %vm266_vm0, %v55_v33  ;;  %1074 = vperm.xlu1 %1226, %v1071_v34   ;;  %v159_v34 = vpop.permute.xlu0 %158 }
  0xac   :  { %734 = vperm.xlu0 %1225, %v636_v35  }
  0xb2   :  { %1158 = vmatmul.msk.f32.gmra.mxu0 %vm266_vm0, %v56_v37  ;;  %v1732_v36 = vpop.permute.xlu0 %223  ;;  %v149_v37 = vpop.permute.xlu1 %148 }
  0xba   :  { %1159 = vmatmul.msk.f32.gmra.mxu0 %vm266_vm0, %v57_v39  ;;  %v154_v39 = vpop.permute.xlu2 %153  ;;  %v144_v40 = vpop.permute.xlu0 %143 }
  0xbb   :  { %v1734_v43 = vpop.permute.xlu1 %213 }
  0xbf   :  { %v1637_v41 = vpop.f32.mrf.mxu0 }
  0xc2   :  { %1160 = vmatmul.msk.f32.gmra.mxu0 %vm266_vm0, %v58_v42 }
  0xc6   :  { %v500_v46 = vpop.f32.mrf.mxu3 }
  0xc7   :  { %v1646_v44 = vpop.f32.mrf.mxu0  ;;  %v1717_v29 = vadd.f32 %v500_v46, %v229_v28 }
  0xc9   :  { %v548_v33 = vmax.f32 %v1717_v29, 0.0 }
  0xca   :  { %1161 = vmatmul.msk.f32.gmra.mxu0 %vm266_vm0, %v59_v45  ;;  %v1736_v45 = vpop.permute.xlu2 %218 }
  0xce   :  { %v503_v49 = vpop.f32.mrf.mxu3 }
  0xcf   :  { %v1652_v47 = vpop.f32.mrf.mxu0  ;;  %v1712_v26 = vadd.f32 %v503_v49, %v234_v25  ;;  %v134_v49 = vpop.permute.xlu1 %133 }
  0xd1   :  { %v549_v31 = vmax.f32 %v1712_v26, 0.0 }
  0xd2   :  { %1162 = vmatmul.msk.f32.gmra.mxu0 %vm266_vm0, %v60_v48  ;;  %v1738_v48 = vpop.permute.xlu0 %208 }
  0xd6   :  { %v506_v52 = vpop.f32.mrf.mxu3 }
  0xd7   :  { %v1658_v50 = vpop.f32.mrf.mxu0  ;;  %v1707_v23 = vadd.f32 %v506_v52, %v239_v21 }
  0xd9   :  { %v550_v30 = vmax.f32 %v1707_v23, 0.0 }
  0xda   :  { %1163 = vmatmul.msk.f32.gmra.mxu0 %vm266_vm0, %v61_v51  ;;  %v139_v51 = vpop.permute.xlu2 %138 }
  0xde   :  { %v509_v55 = vpop.f32.mrf.mxu3 }
  0xdf   :  { %v1664_v53 = vpop.f32.mrf.mxu0  ;;  %v1702_v19 = vadd.f32 %v509_v55, %v244_v4 }
  0xe1   :  { %v551_v27 = vmax.f32 %v1702_v19, 0.0 }
  0xe2   :  { %1164 = vmatmul.msk.f32.gmra.mxu0 %vm266_vm0, %v62_v54 }
  0xe6   :  { %v512_v60 = vpop.f32.mrf.mxu3 }
  0xe7   :  { %v1672_v57 = vpop.f32.mrf.mxu0  ;;  %v1698_v16 = vadd.f32 %v512_v60, %v249_v3  ;;  %v129_v60 = vpop.permute.xlu0 %128 }
  0xe9   :  { %v552_v24 = vmax.f32 %v1698_v16, 0.0 }
  0xea   :  { %1165 = vmatmul.msk.f32.gmra.mxu0 %vm266_vm0, %v63_v58 }
  0xee   :  { %v515_v1 = vpop.f32.mrf.mxu3 }
  0xef   :  { %v1678_v63 = vpop.f32.mrf.mxu0  ;;  %v1694_v14 = vadd.f32 %v515_v1, %v254_v62  ;;  %v1741_v1 = vpop.permute.xlu1 %198 }
  0xf1   :  { %v553_v20 = vmax.f32 %v1694_v14, 0.0  ;;  %v560_v14 = vld [vmem:[%s2132_s3 + $0x20] sm:$0xff] }
  0xf2   :  { %1166 = vmatmul.msk.f32.gmra.mxu0 %vm266_vm0, %v64_v0 }
  0xf6   :  { %v518_v7 = vpop.f32.mrf.mxu3 }
  0xf7   :  { %v1684_v5 = vpop.f32.mrf.mxu0  ;;  %v1692_v11 = vadd.f32 %v518_v7, %v259_v2  ;;  %v119_v28 = vpop.permute.xlu1 %118 }
  0xf8   :  { %v450_v21 = vadd.f32 %v1684_v5, %v144_v40 }
  0xf9   :  { %v554_v17 = vmax.f32 %v1692_v11, 0.0 }
  0xfa   :  { %1167 = vmatmul.msk.f32.gmra.mxu0 %vm266_vm0, %v65_v6 }
  0xfe   :  { %v521_v13 = vpop.f32.mrf.mxu3 }
  0xff   :  { %v1690_v10 = vpop.f32.mrf.mxu0  ;;  %v1696_v15 = vadd.f32 %v521_v13, %v264_v59 }
 0x101   :  { %v555_v18 = vmax.f32 %v1696_v15, 0.0  ;;  %v616_v15 = vld [vmem:[%s2132_s3 + $0x1e0] sm:$0xff] }
 0x103   :  { %925 = vmatpush.msra.mxu2 %v555_v18 }
 0x105   :  { %926 = vmatpush.msra.mxu2 %v554_v17 }
 0x107   :  { %v455_v22 = vpop.f32.mrf.mxu0  ;;  %927 = vmatpush.msra.mxu2 %v553_v20 }
 0x109   :  { %928 = vmatpush.msra.mxu2 %v552_v24 }
 0x10b   :  { %929 = vmatpush.msra.mxu2 %v551_v27 }
 0x10d   :  { %930 = vmatpush.msra.mxu2 %v550_v30 }
 0x10f   :  { %v458_v32 = vpop.f32.mrf.mxu0  ;;  %931 = vmatpush.msra.mxu2 %v549_v31 }
 0x110   :  { %v459_v6 = vadd.f32 %v458_v32, %v159_v34 }
 0x111   :  { %932 = vmatpush.msra.mxu2 %v548_v33 }
 0x112   :  { %v534_v13 = vmax.f32 %v459_v6, 0.0 }
 0x117   :  { %v461_v35 = vpop.f32.mrf.mxu0 }
 0x118   :  { %v462_v2 = vadd.f32 %v461_v35, %v164_v12  ;;  %v1748_v12 = vpop.permute.xlu0 %193  ;;  %v531_v35 = vmax.f32 %v450_v21, 0.0  ;;  %v617_v21 = vld [vmem:[%s2132_s3 + $0x1e8] sm:$0xff] }
 0x11f   :  { %v464_v38 = vpop.f32.mrf.mxu0 }
 0x120   :  { %v465_v62 = vadd.f32 %v464_v38, %v169_v9  ;;  %v453_v9 = vadd.f32 %v1690_v10, %v149_v37  ;;  %v444_v10 = vadd.f32 %v1672_v57, %v134_v49  ;;  %v441_v38 = vadd.f32 %v1664_v53, %v129_v60  ;;  %v109_v49 = vpop.permute.xlu1 %108  ;;  %v614_v60 = vld [vmem:[%s2132_s3 + $0x1d0] sm:$0xff] }
 0x122   :  { %v536_v7 = vmax.f32 %v465_v62, 0.0  ;;  %v532_v34 = vmax.f32 %v453_v9, 0.0  ;;  %v529_v40 = vmax.f32 %v444_v10, 0.0  ;;  %v528_v57 = vmax.f32 %v441_v38, 0.0  ;;  %v615_v9 = vld [vmem:[%s2132_s3 + $0x1d8] sm:$0xff]  ;;  %v578_v10 = vld [vmem:[%s2132_s3 + $0xb0] sm:$0xff] }
 0x123   :  { %v569_v38 = vld [vmem:[%s2132_s3 + $0x68] sm:$0xff] }
 0x127   :  { %v467_v42 = vpop.f32.mrf.mxu0 }
 0x128   :  { %v468_v58 = vadd.f32 %v467_v42, %v174_v8  ;;  %v535_v8 = vmax.f32 %v462_v2, 0.0 }
 0x12a   :  { %v537_v3 = vmax.f32 %v468_v58, 0.0 }
 0x12f   :  { %v470_v46 = vpop.f32.mrf.mxu0 }
 0x130   :  { %v471_v54 = vadd.f32 %v470_v46, %v179_v61  ;;  %v456_v61 = vadd.f32 %v455_v22, %v154_v39  ;;  %v447_v22 = vadd.f32 %v1678_v63, %v139_v51  ;;  %v114_v63 = vpop.permute.xlu0 %113  ;;  %v435_v46 = vadd.f32 %v1652_v47, %v119_v28  ;;  %v556_v47 = vld [vmem:[%s2132_s3] sm:$0xff]  ;;  %v563_v28 = vld [vmem:[%s2132_s3 + $0x38] sm:$0xff] }
 0x131   :  { %v432_v51 = vadd.f32 %v1646_v44, %v114_v63  ;;  %v612_v44 = vld [vmem:[%s2132_s3 + $0x1c0] sm:$0xff]  ;;  %v573_v63 = vld [vmem:[%s2132_s3 + $0x88] sm:$0xff] }
 0x132   :  { %v538_v0 = vmax.f32 %v471_v54, 0.0  ;;  %v533_v25 = vmax.f32 %v456_v61, 0.0  ;;  %v530_v5 = vmax.f32 %v447_v22, 0.0  ;;  %v570_v61 = vld [vmem:[%s2132_s3 + $0x70] sm:$0xff]  ;;  %v576_v22 = vld [vmem:[%s2132_s3 + $0xa0] sm:$0xff] }
 0x133   :  { %v525_v54 = vmax.f32 %v432_v51, 0.0  ;;  %v577_v51 = vld [vmem:[%s2132_s3 + $0xa8] sm:$0xff] }
 0x137   :  { %v473_v52 = vpop.f32.mrf.mxu0 }
 0x138   :  { %v474_v55 = vadd.f32 %v473_v52, %v1670_v56  ;;  %v1745_v56 = vpop.permute.xlu2 %203  ;;  %v429_v52 = vadd.f32 %v1637_v41, %v109_v49  ;;  %v588_v49 = vld [vmem:[%s2132_s3 + $0x100] sm:$0xff] }
 0x13a   :  { %v539_v59 = vmax.f32 %v474_v55, 0.0  ;;  %v524_v58 = vmax.f32 %v429_v52, 0.0  ;;  %v590_v52 = vld [vmem:[%s2132_s3 + $0x110] sm:$0xff] }
 0x13c   :  { %812 = vmatpush.msra.mxu1 %v539_v59  ;;  %1192 = vmatpush.msrb.mxu3 %v539_v59  ;;  %v558_v59 = vld [vmem:[%s2132_s3 + $0x10] sm:$0xff] }
 0x13e   :  { %813 = vmatpush.msra.mxu1 %v538_v0  ;;  %1193 = vmatpush.msrb.mxu3 %v538_v0 }
 0x13f   :  { %v1743_v4 = vpop.f32.mrf.mxu0 }
 0x140   :  { %814 = vmatpush.msra.mxu1 %v537_v3  ;;  %1194 = vmatpush.msrb.mxu3 %v537_v3  ;;  %v124_v37 = vpop.permute.xlu2 %123 }
 0x141   :  { %v438_v39 = vadd.f32 %v1658_v50, %v124_v37  ;;  %v526_v50 = vmax.f32 %v435_v46, 0.0  ;;  %v580_v37 = vld [vmem:[%s2132_s3 + $0xc0] sm:$0xff]  ;;  %v575_v46 = vld [vmem:[%s2132_s3 + $0x98] sm:$0xff] }
 0x142   :  { %815 = vmatpush.msra.mxu1 %v536_v7  ;;  %1195 = vmatpush.msrb.mxu3 %v536_v7  ;;  %v568_v7 = vld [vmem:[%s2132_s3 + $0x60] sm:$0xff] }
 0x143   :  { %v527_v53 = vmax.f32 %v438_v39, 0.0  ;;  %v571_v39 = vld [vmem:[%s2132_s3 + $0x78] sm:$0xff] }
 0x144   :  { %816 = vmatpush.msra.mxu1 %v535_v8  ;;  %1196 = vmatpush.msrb.mxu3 %v535_v8  ;;  %v559_v8 = vld [vmem:[%s2132_s3 + $0x18] sm:$0xff] }
 0x146   :  { %817 = vmatpush.msra.mxu1 %v534_v13  ;;  %1197 = vmatpush.msrb.mxu3 %v534_v13  ;;  %v572_v13 = vld [vmem:[%s2132_s3 + $0x80] sm:$0xff] }
 0x147   :  { %v1751_v32 = vpop.f32.mrf.mxu0 }
 0x148   :  { %818 = vmatpush.msra.mxu1 %v533_v25  ;;  %1198 = vmatpush.msrb.mxu3 %v533_v25  ;;  %v189_v0 = vpop.permute.xlu2 %188  ;;  %v574_v25 = vld [vmem:[%s2132_s3 + $0x90] sm:$0xff] }
 0x149   :  { %v477_v2 = vadd.f32 %v1743_v4, %v189_v0  ;;  %v613_v4 = vld [vmem:[%s2132_s3 + $0x1c8] sm:$0xff] }
 0x14a   :  { %819 = vmatpush.msra.mxu1 %v532_v34  ;;  %1199 = vmatpush.msrb.mxu3 %v532_v34  ;;  %v565_v34 = vld [vmem:[%s2132_s3 + $0x48] sm:$0xff] }
 0x14b   :  { %v540_v6 = vmax.f32 %v477_v2, 0.0  ;;  %v593_v0 = vld [vmem:[%s2132_s3 + $0x128] sm:$0xff] }
 0x14c   :  { %820 = vmatpush.msra.mxu1 %v531_v35  ;;  %1200 = vmatpush.msrb.mxu3 %v531_v35  ;;  %v567_v35 = vld [vmem:[%s2132_s3 + $0x58] sm:$0xff] }
 0x14e   :  { %821 = vmatpush.msra.mxu1 %v530_v5  ;;  %1201 = vmatpush.msrb.mxu3 %v530_v5  ;;  %v582_v5 = vld [vmem:[%s2132_s3 + $0xd0] sm:$0xff] }
 0x14f   :  { %v1757_v42 = vpop.f32.mrf.mxu0 }
 0x150   :  { %822 = vmatpush.msra.mxu1 %v529_v40  ;;  %1202 = vmatpush.msrb.mxu3 %v529_v40  ;;  %v584_v40 = vld [vmem:[%s2132_s3 + $0xe0] sm:$0xff] }
 0x152   :  { %823 = vmatpush.msra.mxu1 %v528_v57  ;;  %1203 = vmatpush.msrb.mxu3 %v528_v57 }
 0x154   :  { %824 = vmatpush.msra.mxu1 %v527_v53  ;;  %1204 = vmatpush.msrb.mxu3 %v527_v53 }
 0x156   :  { %825 = vmatpush.msra.mxu1 %v526_v50  ;;  %1205 = vmatpush.msrb.mxu3 %v526_v50  ;;  %v579_v50 = vld [vmem:[%s2132_s3 + $0xb8] sm:$0xff] }
 0x157   :  { %v485_v55 = vpop.f32.mrf.mxu0 }
 0x158   :  { %826 = vmatpush.msra.mxu1 %v525_v54  ;;  %1206 = vmatpush.msrb.mxu3 %v525_v54 }
 0x15a   :  { %827 = vmatpush.msra.mxu1 %v524_v58  ;;  %1207 = vmatpush.msrb.mxu3 %v524_v58  ;;  %v581_v58 = vld [vmem:[%s2132_s3 + $0xc8] sm:$0xff] }
 0x15b   :  { %828 = vmatmul.f32.vlgmr.msra.gmra.mxu1 %v556_v47  ;;  %912 = vmatmul.f32.vlgmr.msrb.gmra.mxu3 %v612_v44  ;;  %v1914_v47 = vpop.permute.xlu2 %729  ;;  %v594_v44 = vld [vmem:[%s2132_s3 + $0x130] sm:$0xff] }
 0x15c   :  { %1208 = vmatpush.msra.mxu3 %v555_v18  ;;  %v618_v18 = vld [vmem:[%s2132_s3 + $0x1f0] sm:$0xff] }
 0x15e   :  { %1209 = vmatpush.msra.mxu3 %v554_v17  ;;  %v562_v17 = vld [vmem:[%s2132_s3 + $0x30] sm:$0xff] }
 0x15f   :  { %v488_v41 = vpop.f32.mrf.mxu0 }
 0x160   :  { %1210 = vmatpush.msra.mxu3 %v553_v20  ;;  %v489_v29 = vadd.f32 %v488_v41, %v1738_v48  ;;  %v480_v48 = vadd.f32 %v1751_v32, %v1748_v12  ;;  %v561_v12 = vld [vmem:[%s2132_s3 + $0x28] sm:$0xff]  ;;  %v619_v32 = vld [vmem:[%s2132_s3 + $0x1f8] sm:$0xff] }
 0x161   :  { %v583_v41 = vld [vmem:[%s2132_s3 + $0xd8] sm:$0xff] }
 0x162   :  { %1211 = vmatpush.msra.mxu3 %v552_v24  ;;  %v564_v24 = vld [vmem:[%s2132_s3 + $0x40] sm:$0xff] }
 0x163   :  { %831 = vmatmul.f32.gmra.mxu1 %v558_v59  ;;  %915 = vmatmul.f32.gmra.mxu3 %v614_v60  ;;  %v596_v60 = vld [vmem:[%s2132_s3 + $0x140] sm:$0xff] }
 0x164   :  { %1212 = vmatpush.msra.mxu3 %v551_v27 }
 0x166   :  { %1213 = vmatpush.msra.mxu3 %v550_v30 }
 0x167   :  { %v491_v11 = vpop.f32.mrf.mxu0 }
 0x168   :  { %1214 = vmatpush.msra.mxu3 %v549_v31  ;;  %v492_v26 = vadd.f32 %v491_v11, %v1734_v43  ;;  %v486_v31 = vadd.f32 %v485_v55, %v1745_v56  ;;  %v566_v43 = vld [vmem:[%s2132_s3 + $0x50] sm:$0xff]  ;;  %v557_v56 = vld [vmem:[%s2132_s3 + $0x8] sm:$0xff]  ;;  %v592_v55 = vld [vmem:[%s2132_s3 + $0x120] sm:$0xff] }
 0x169   :  { %v585_v11 = vld [vmem:[%s2132_s3 + $0xe8] sm:$0xff] }
 0x16a   :  { %1215 = vmatpush.msra.mxu3 %v548_v33  ;;  %v545_v33 = vmax.f32 %v492_v26, 0.0  ;;  %v543_v62 = vmax.f32 %v486_v31, 0.0  ;;  %v602_v31 = vld [vmem:[%s2132_s3 + $0x170] sm:$0xff] }
 0x16b   :  { %834 = vmatmul.f32.gmra.mxu1 %v560_v14  ;;  %918 = vmatmul.f32.gmra.mxu3 %v616_v15  ;;  %v1930_v14 = vpop.permute.xlu2 %714 }
 0x16f   :  { %v494_v16 = vpop.f32.mrf.mxu0 }
 0x170   :  { %v495_v20 = vadd.f32 %v494_v16, %v1736_v45  ;;  %v544_v45 = vmax.f32 %v489_v29, 0.0  ;;  %v598_v16 = vld [vmem:[%s2132_s3 + $0x150] sm:$0xff] }
 0x172   :  { %v546_v30 = vmax.f32 %v495_v20, 0.0 }
 0x173   :  { %837 = vmatmul.f32.gmra.mxu1 %v562_v17  ;;  %921 = vmatmul.f32.gmra.mxu3 %v618_v18  ;;  %v587_v17 = vld [vmem:[%s2132_s3 + $0xf8] sm:$0xff]  ;;  %v1938_v18 = vpop.permute.xlu0 %724 }
 0x177   :  { %v497_v19 = vpop.f32.mrf.mxu0 }
 0x178   :  { %v498_v23 = vadd.f32 %v497_v19, %v1732_v36  ;;  %v483_v36 = vadd.f32 %v1757_v42, %v1741_v1  ;;  %v541_v1 = vmax.f32 %v480_v48, 0.0  ;;  %v586_v42 = vld [vmem:[%s2132_s3 + $0xf0] sm:$0xff]  ;;  %v1940_v19 = vpop.permute.xlu2 %704 }
 0x17a   :  { %v547_v27 = vmax.f32 %v498_v23, 0.0  ;;  %v542_v3 = vmax.f32 %v483_v36, 0.0  ;;  %v600_v23 = vld [vmem:[%s2132_s3 + $0x160] sm:$0xff]  ;;  %v1960_v36 = vpop.permute.xlu1 %719 }
 0x17b   :  { %840 = vmatmul.f32.gmra.mxu1 %v564_v24  ;;  %v589_v24 = vld [vmem:[%s2132_s3 + $0x108] sm:$0xff]  ;;  %v1948_v26 = vpop.permute.xlu0 %709 }
 0x17c   :  { %933 = vmatpush.msra.mxu2 %v547_v27  ;;  %1216 = vmatpush.msra.mxu3 %v547_v27 }
 0x17e   :  { %934 = vmatpush.msra.mxu2 %v546_v30  ;;  %1217 = vmatpush.msra.mxu3 %v546_v30 }
 0x180   :  { %935 = vmatpush.msra.mxu2 %v545_v33  ;;  %1218 = vmatpush.msra.mxu3 %v545_v33  ;;  %v1950_v27 = vpop.permute.xlu2 %799  ;;  %v591_v33 = vld [vmem:[%s2132_s3 + $0x118] sm:$0xff] }
 0x182   :  { %936 = vmatpush.msra.mxu2 %v544_v45  ;;  %1219 = vmatpush.msra.mxu3 %v544_v45 }
 0x183   :  { %843 = vmatmul.f32.gmra.mxu1 %v566_v43  ;;  %v1962_v45 = vpop.permute.xlu0 %804 }
 0x184   :  { %937 = vmatpush.msra.mxu2 %v543_v62  ;;  %1220 = vmatpush.msra.mxu3 %v543_v62  ;;  %v604_v62 = vld [vmem:[%s2132_s3 + $0x180] sm:$0xff] }
 0x186   :  { %938 = vmatpush.msra.mxu2 %v542_v3  ;;  %1221 = vmatpush.msra.mxu3 %v542_v3  ;;  %v1972_v3 = vpop.permute.xlu1 %809 }
 0x188   :  { %939 = vmatpush.msra.mxu2 %v541_v1  ;;  %1222 = vmatpush.msra.mxu3 %v541_v1  ;;  %v690_v48 = vpop.permute.xlu2 %689 }
 0x18a   :  { %940 = vmatpush.msra.mxu2 %v540_v6  ;;  %1223 = vmatpush.msra.mxu3 %v540_v6 }
 0x18b   :  { %846 = vmatmul.f32.gmra.mxu1 %v568_v7  ;;  %941 = vmatmul.f32.vlgmr.msra.gmra.mxu2 %v557_v56  ;;  %v695_v6 = vpop.permute.xlu0 %694  ;;  %v606_v7 = vld [vmem:[%s2132_s3 + $0x190] sm:$0xff]  ;;  %v595_v56 = vld [vmem:[%s2132_s3 + $0x138] sm:$0xff] }
 0x18c   :  { %1025 = vmatmul.f32.vlgmr.msra.gmra.mxu3 %v613_v4 }
 0x190   :  { %v1982_v4 = vpop.permute.xlu2 %784 }
 0x193   :  { %849 = vmatmul.f32.gmra.mxu1 %v570_v61  ;;  %944 = vmatmul.f32.gmra.mxu2 %v559_v8 }
 0x194   :  { %1028 = vmatmul.f32.gmra.mxu3 %v615_v9  ;;  %v1986_v9 = vpop.permute.xlu1 %699 }
 0x19b   :  { %852 = vmatmul.f32.gmra.mxu1 %v572_v13  ;;  %947 = vmatmul.f32.gmra.mxu2 %v561_v12  ;;  %v608_v13 = vld [vmem:[%s2132_s3 + $0x1a0] sm:$0xff]  ;;  %v597_v12 = vld [vmem:[%s2132_s3 + $0x148] sm:$0xff] }
 0x19c   :  { %1031 = vmatmul.f32.gmra.mxu3 %v617_v21  ;;  %v1994_v21 = vpop.permute.xlu0 %789 }
 0x1a3   :  { %855 = vmatmul.f32.gmra.mxu1 %v574_v25  ;;  %950 = vmatmul.f32.gmra.mxu2 %v563_v28  ;;  %v675_v25 = vpop.permute.xlu2 %674 }
 0x1a4   :  { %1034 = vmatmul.f32.gmra.mxu3 %v619_v32 }
 0x1ab   :  { %858 = vmatmul.f32.gmra.mxu1 %v576_v22  ;;  %953 = vmatmul.f32.gmra.mxu2 %v565_v34 }
 0x1b3   :  { %861 = vmatmul.f32.gmra.mxu1 %v578_v10  ;;  %956 = vmatmul.f32.gmra.mxu2 %v567_v35  ;;  %v610_v10 = vld [vmem:[%s2132_s3 + $0x1b0] sm:$0xff]  ;;  %v599_v35 = vld [vmem:[%s2132_s3 + $0x158] sm:$0xff] }
 0x1bb   :  { %864 = vmatmul.f32.gmra.mxu1 %v580_v37  ;;  %959 = vmatmul.f32.gmra.mxu2 %v569_v38  ;;  %v2006_v37 = vpop.permute.xlu1 %794  ;;  %v680_v38 = vpop.permute.xlu0 %679 }
 0x1c3   :  { %867 = vmatmul.f32.gmra.mxu1 %v582_v5  ;;  %962 = vmatmul.f32.gmra.mxu2 %v571_v39 }
 0x1cb   :  { %870 = vmatmul.f32.gmra.mxu1 %v584_v40  ;;  %965 = vmatmul.f32.gmra.mxu2 %v573_v63 }
 0x1d3   :  { %873 = vmatmul.f32.gmra.mxu1 %v586_v42  ;;  %968 = vmatmul.f32.gmra.mxu2 %v575_v46  ;;  %v601_v42 = vld [vmem:[%s2132_s3 + $0x168] sm:$0xff]  ;;  %v685_v46 = vpop.permute.xlu1 %684 }
 0x1d8   :  { %v1890_v57 = vpop.f32.mrf.mxu1 }
 0x1db   :  { %876 = vmatmul.f32.gmra.mxu1 %v588_v49  ;;  %971 = vmatmul.f32.gmra.mxu2 %v577_v51 }
 0x1e0   :  { %v1898_v53 = vpop.f32.mrf.mxu1 }
 0x1e3   :  { %879 = vmatmul.f32.gmra.mxu1 %v590_v52  ;;  %974 = vmatmul.f32.gmra.mxu2 %v579_v50  ;;  %v603_v50 = vld [vmem:[%s2132_s3 + $0x178] sm:$0xff] }
 0x1e8   :  { %v1906_v54 = vpop.f32.mrf.mxu1 }
 0x1eb   :  { %882 = vmatmul.f32.gmra.mxu1 %v592_v55  ;;  %977 = vmatmul.f32.gmra.mxu2 %v581_v58 }
 0x1f0   :  { %v1922_v59 = vpop.f32.mrf.mxu1 }
 0x1f3   :  { %885 = vmatmul.f32.gmra.mxu1 %v594_v44  ;;  %980 = vmatmul.f32.gmra.mxu2 %v583_v41 }
 0x1f8   :  { %v841_v15 = vpop.f32.mrf.mxu1 }
 0x1f9   :  { %v842_v28 = vadd.f32 %v841_v15, %v675_v25 }
 0x1fb   :  { %888 = vmatmul.f32.gmra.mxu1 %v596_v60  ;;  %983 = vmatmul.f32.gmra.mxu2 %v585_v11  ;;  %v605_v60 = vld [vmem:[%s2132_s3 + $0x188] sm:$0xff] }
 0x200   :  { %v844_v20 = vpop.f32.mrf.mxu1 }
 0x201   :  { %v845_v5 = vadd.f32 %v844_v20, %v680_v38  ;;  %v607_v20 = vld [vmem:[%s2132_s3 + $0x198] sm:$0xff] }
 0x203   :  { %891 = vmatmul.f32.gmra.mxu1 %v598_v16  ;;  %986 = vmatmul.f32.gmra.mxu2 %v587_v17 }
 0x208   :  { %v847_v30 = vpop.f32.mrf.mxu1 }
 0x209   :  { %v848_v49 = vadd.f32 %v847_v30, %v685_v46  ;;  %v609_v30 = vld [vmem:[%s2132_s3 + $0x1a8] sm:$0xff] }
 0x20b   :  { %894 = vmatmul.f32.gmra.mxu1 %v600_v23  ;;  %989 = vmatmul.f32.gmra.mxu2 %v589_v24 }
 0x20e   :  { %v1952_v29 = vpop.f32.mrf.mxu2 }
 0x210   :  { %v850_v2 = vpop.f32.mrf.mxu1 }
 0x211   :  { %v851_v58 = vadd.f32 %v850_v2, %v690_v48 }
 0x213   :  { %897 = vmatmul.f32.gmra.mxu1 %v602_v31  ;;  %992 = vmatmul.f32.gmra.mxu2 %v591_v33  ;;  %v2033_v31 = vpop.f32.mrf.mxu3 }
 0x216   :  { %v1964_v43 = vpop.f32.mrf.mxu2 }
 0x218   :  { %v853_v61 = vpop.f32.mrf.mxu1 }
 0x219   :  { %v854_v15 = vadd.f32 %v853_v61, %v695_v6 }
 0x21b   :  { %900 = vmatmul.f32.gmra.mxu1 %v604_v62  ;;  %995 = vmatmul.f32.gmra.mxu2 %v593_v0  ;;  %v611_v62 = vld [vmem:[%s2132_s3 + $0x1b8] sm:$0xff]  ;;  %v2038_v0 = vpop.permute.xlu0 %774  ;;  %v2040_v6 = vpop.f32.mrf.mxu3 }
 0x21c   :  { %2135 = vst [vmem:[#allocation2_spill] sm:$0xff] %v2038_v0 }
 0x21e   :  { %v1974_v1 = vpop.f32.mrf.mxu2 }
 0x220   :  { %v1996_v32 = vpop.f32.mrf.mxu1 }
 0x223   :  { %903 = vmatmul.f32.gmra.mxu1 %v606_v7  ;;  %998 = vmatmul.f32.gmra.mxu2 %v595_v56  ;;  %v2042_v56 = vpop.permute.xlu0 %664 }
 0x226   :  { %v1984_v8 = vpop.f32.mrf.mxu2 }
 0x228   :  { %v2010_v63 = vpop.f32.mrf.mxu1 }
 0x22b   :  { %906 = vmatmul.f32.gmra.mxu1 %v608_v13  ;;  %1001 = vmatmul.f32.gmra.mxu2 %v597_v12  ;;  %v2044_v13 = vpop.f32.mrf.mxu3  ;;  %v2046_v12 = vpop.permute.xlu1 %779 }
 0x22c   :  { %2136 = vst [vmem:[#allocation3_spill] sm:$0xff] %v2046_v12 }
 0x22e   :  { %v954_v22 = vpop.f32.mrf.mxu2 }
 0x22f   :  { %v1998_v34 = vadd.f32 %v954_v22, %v842_v28  ;;  %v2048_v28 = vpop.permute.xlu2 %769 }
 0x230   :  { %v862_v55 = vpop.f32.mrf.mxu1  ;;  %2137 = vst [vmem:[#allocation4_spill] sm:$0xff] %v2048_v28 }
 0x233   :  { %909 = vmatmul.f32.gmra.mxu1 %v610_v10  ;;  %1004 = vmatmul.f32.gmra.mxu2 %v599_v35  ;;  %v2050_v10 = vpop.permute.xlu0 %759  ;;  %v2052_v35 = vpop.f32.mrf.mxu3 }
 0x234   :  { %2138 = vst [vmem:[#allocation5_spill] sm:$0xff] %v2050_v10  ;;  %v670_v38 = vpop.permute.xlu1 %669 }
 0x236   :  { %v957_v39 = vpop.f32.mrf.mxu2 }
 0x237   :  { %v2008_v40 = vadd.f32 %v957_v39, %v845_v5 }
 0x238   :  { %v865_v11 = vpop.f32.mrf.mxu1 }
 0x23b   :  { %1007 = vmatmul.f32.gmra.mxu2 %v601_v42  ;;  %v2054_v42 = vpop.permute.xlu2 %659  ;;  %v2056_v46 = vpop.permute.xlu0 %749 }
 0x23e   :  { %v960_v51 = vpop.f32.mrf.mxu2 }
 0x23f   :  { %v2015_v52 = vadd.f32 %v960_v51, %v848_v49  ;;  %v1070_v49 = vld [vmem:[%s2133_s5] sm:$0xff]  ;;  %v2061_v51 = vpop.f32.mrf.mxu3 }
 0x240   :  { %v868_v23 = vpop.f32.mrf.mxu1  ;;  %1078 = vst [vmem:[#allocation1] ss:$2 sm:$0xff] %v1070_v49  ;;  %v863_v49 = vadd.f32 %v862_v55, %v1948_v26 }
 0x243   :  { %1010 = vmatmul.f32.gmra.mxu2 %v603_v50  ;;  %v2069_v0 = vpop.permute.xlu2 %754 }
 0x246   :  { %v963_v44 = vpop.f32.mrf.mxu2 }
 0x247   :  { %v2020_v41 = vadd.f32 %v963_v44, %v851_v58 }
 0x248   :  { %v871_v48 = vpop.f32.mrf.mxu1 }
 0x249   :  { %v872_v50 = vadd.f32 %v871_v48, %v1938_v18 }
 0x24b   :  { %1013 = vmatmul.f32.gmra.mxu2 %v605_v60  ;;  %v869_v60 = vadd.f32 %v868_v23, %v1960_v36  ;;  %v860_v36 = vadd.f32 %v2010_v63, %v1940_v19 }
 0x24e   :  { %v966_v16 = vpop.f32.mrf.mxu2 }
 0x24f   :  { %v2025_v17 = vadd.f32 %v966_v16, %v854_v15 }
 0x250   :  { %v874_v7 = vpop.f32.mrf.mxu1 }
 0x251   :  { %v875_v58 = vadd.f32 %v874_v7, %v1914_v47  ;;  %v735_v47 = vpop.permute.xlu0 %734 }
 0x253   :  { %1016 = vmatmul.f32.gmra.mxu2 %v607_v20  ;;  %v2066_v20 = vpop.permute.xlu1 %764 }
 0x256   :  { %v969_v24 = vpop.f32.mrf.mxu2 }
 0x258   :  { %v877_v25 = vpop.f32.mrf.mxu1 }
 0x259   :  { %v878_v23 = vadd.f32 %v877_v25, %v735_v47 }
 0x25b   :  { %1019 = vmatmul.f32.gmra.mxu2 %v609_v30 }
 0x25e   :  { %v972_v33 = vpop.f32.mrf.mxu2 }
 0x260   :  { %v880_v5 = vpop.f32.mrf.mxu1 }
 0x263   :  { %1022 = vmatmul.f32.gmra.mxu2 %v611_v62  ;;  %v866_v62 = vadd.f32 %v865_v11, %v1930_v14  ;;  %v857_v11 = vadd.f32 %v1996_v32, %v1986_v9 }
 0x265   :  { %v970_v55 = vadd.f32 %v969_v24, %v857_v11  ;;  %v839_v24 = vadd.f32 %v1922_v59, %v670_v38 }
 0x266   :  { %v975_v2 = vpop.f32.mrf.mxu2 }
 0x267   :  { %v976_v48 = vadd.f32 %v975_v2, %v863_v49  ;;  %v740_v2 = vpop.permute.xlu2 %739  ;;  %v1047_v25 = vmax.f32 %v970_v55, 0.0 }
 0x268   :  { %v883_v30 = vpop.f32.mrf.mxu1 }
 0x26e   :  { %v978_v61 = vpop.f32.mrf.mxu2 }
 0x26f   :  { %v979_v12 = vadd.f32 %v978_v61, %v866_v62  ;;  %v1049_v61 = vmax.f32 %v976_v48, 0.0 }
 0x270   :  { %v886_v19 = vpop.f32.mrf.mxu1 }
 0x271   :  { %v887_v47 = vadd.f32 %v886_v19, %v2056_v46 }
 0x276   :  { %v981_v22 = vpop.f32.mrf.mxu2 }
 0x277   :  { %v982_v10 = vadd.f32 %v981_v22, %v869_v60  ;;  %v973_v22 = vadd.f32 %v972_v33, %v860_v36  ;;  %v1045_v33 = vmax.f32 %v2020_v41, 0.0  ;;  %v833_v41 = vadd.f32 %v1898_v53, %v2054_v42 }
 0x278   :  { %v917_v36 = vadd.f32 %v2040_v6, %v1950_v27 }
 0x279   :  { %v1051_v7 = vmax.f32 %v982_v10, 0.0  ;;  %v1048_v63 = vmax.f32 %v973_v22, 0.0  ;;  %v881_v10 = vadd.f32 %v880_v5, %v740_v2  ;;  %v836_v5 = vadd.f32 %v1906_v54, %v2042_v56 }
 0x27a   :  { %v946_v54 = vadd.f32 %v1964_v43, %v833_v41  ;;  %v923_v56 = vadd.f32 %v2052_v35, %v1972_v3  ;;  %v914_v35 = vadd.f32 %v2033_v31, %v2006_v37 }
 0x27b   :  { %v949_v59 = vadd.f32 %v1974_v1, %v836_v5  ;;  %v920_v1 = vadd.f32 %v2044_v13, %v1962_v45 }
 0x27c   :  { %v1027_v46 = vadd.f32 %v2061_v51, %v914_v35 }
 0x27d   :  { %v1040_v53 = vmax.f32 %v949_v59, 0.0 }
 0x27e   :  { %v984_v39 = vpop.f32.mrf.mxu2  ;;  %v1066_v11 = vmax.f32 %v1027_v46, 0.0 }
 0x27f   :  { %v985_v15 = vadd.f32 %v984_v39, %v872_v50  ;;  %v2074_v39 = vpop.f32.mrf.mxu3  ;;  %v1050_v50 = vmax.f32 %v979_v12, 0.0  ;;  %v1044_v12 = vmax.f32 %v2015_v52, 0.0  ;;  %v1042_v52 = vmax.f32 %v1998_v34, 0.0 }
 0x280   :  { %v1039_v34 = vmax.f32 %v946_v54, 0.0  ;;  %v1030_v45 = vadd.f32 %v2074_v39, %v917_v36 }
 0x281   :  { %v1052_v18 = vmax.f32 %v985_v15, 0.0  ;;  %v889_v15 = vpop.f32.mrf.mxu1 }
 0x282   :  { %v890_v27 = vadd.f32 %v889_v15, %v2069_v0 }
 0x286   :  { %v987_v44 = vpop.f32.mrf.mxu2 }
 0x287   :  { %v988_v16 = vadd.f32 %v987_v44, %v875_v58  ;;  %v1046_v44 = vmax.f32 %v2025_v17, 0.0  ;;  %v1032_v32 = vpop.f32.mrf.mxu3  ;;  %v1043_v17 = vmax.f32 %v2008_v40, 0.0 }
 0x288   :  { %v1033_v48 = vadd.f32 %v1032_v32, %v920_v1 }
 0x289   :  { %v1053_v28 = vmax.f32 %v988_v16, 0.0  ;;  %v952_v16 = vadd.f32 %v1984_v8, %v839_v24 }
 0x28b   :  { %1083 = vmatpush.msrb.mxu3 %v1053_v28  ;;  %v655_v28 = vpop.permute.xlu1 %654  ;;  %v1041_v8 = vmax.f32 %v952_v16, 0.0  ;;  %v2141_v16 = vld [vmem:[#allocation4_spill] sm:$0xff] }
 0x28d   :  { %1084 = vmatpush.msrb.mxu3 %v1052_v18  ;;  %v830_v18 = vadd.f32 %v1890_v57, %v655_v28  ;;  %v892_v57 = vpop.f32.mrf.mxu1 }
 0x28e   :  { %v990_v14 = vpop.f32.mrf.mxu2 }
 0x28f   :  { %v2078_v26 = vadd.f32 %v990_v14, %v878_v23  ;;  %1085 = vmatpush.msrb.mxu3 %v1051_v7  ;;  %v1035_v40 = vpop.f32.mrf.mxu3  ;;  %v1068_v7 = vmax.f32 %v1033_v48, 0.0  ;;  %v1067_v14 = vmax.f32 %v1030_v45, 0.0 }
 0x290   :  { %v1036_v42 = vadd.f32 %v1035_v40, %v923_v56 }
 0x291   :  { %1086 = vmatpush.msrb.mxu3 %v1050_v50 }
 0x292   :  { %v1069_v13 = vmax.f32 %v1036_v42, 0.0  ;;  %v1054_v42 = vmax.f32 %v2078_v26, 0.0 }
 0x293   :  { %1087 = vmatpush.msrb.mxu3 %v1049_v61  ;;  %v745_v60 = vpop.permute.xlu1 %744 }
 0x294   :  { %v884_v62 = vadd.f32 %v883_v30, %v745_v60  ;;  %v943_v30 = vadd.f32 %v1952_v29, %v830_v18  ;;  %v1079_v29 = vld.sshfl [vmem:[#allocation1] sm:$0xff pattern:$0x75316420] }
 0x295   :  { %1088 = vmatpush.msrb.mxu3 %v1048_v63  ;;  %v895_v50 = vpop.f32.mrf.mxu1 }
 0x296   :  { %v993_v58 = vpop.f32.mrf.mxu2  ;;  %v1038_v23 = vmax.f32 %v943_v30, 0.0  ;;  %v896_v41 = vadd.f32 %v895_v50, %v2066_v20 }
 0x297   :  { %v2081_v9 = vadd.f32 %v993_v58, %v881_v10  ;;  %1089 = vmatpush.msrb.mxu3 %v1047_v25 }
 0x299   :  { %1090 = vmatpush.msrb.mxu3 %v1046_v44  ;;  %v2139_v44 = vld [vmem:[#allocation3_spill] sm:$0xff] }
 0x29b   :  { %1091 = vmatpush.msrb.mxu3 %v1045_v33 }
 0x29d   :  { %1092 = vmatpush.msrb.mxu3 %v1044_v12  ;;  %v898_v31 = vpop.f32.mrf.mxu1  ;;  %v2140_v12 = vld [vmem:[#allocation2_spill] sm:$0xff] }
 0x29e   :  { %v996_v49 = vpop.f32.mrf.mxu2 }
 0x29f   :  { %v2094_v38 = vadd.f32 %v996_v49, %v884_v62  ;;  %1093 = vmatpush.msrb.mxu3 %v1043_v17  ;;  %v899_v17 = vadd.f32 %v898_v31, %v2141_v16 }
 0x2a1   :  { %1094 = vmatpush.msrb.mxu3 %v1042_v52  ;;  %v1056_v20 = vmax.f32 %v2094_v38, 0.0 }
 0x2a3   :  { %1095 = vmatpush.msrb.mxu3 %v1041_v8 }
 0x2a5   :  { %1096 = vmatpush.msrb.mxu3 %v1040_v53  ;;  %v901_v55 = vpop.f32.mrf.mxu1 }
 0x2a6   :  { %v999_v43 = vpop.f32.mrf.mxu2  ;;  %v902_v60 = vadd.f32 %v901_v55, %v2140_v12 }
 0x2a7   :  { %v2106_v3 = vadd.f32 %v999_v43, %v887_v47  ;;  %1097 = vmatpush.msrb.mxu3 %v1039_v34  ;;  %v1055_v34 = vmax.f32 %v2081_v9, 0.0  ;;  %v1080_v47 = vld.sshfl [vmem:[#allocation1 + $0x8] sm:$0xff pattern:$0x75316420]  ;;  %v1075_v43 = vpop.permute.xlu1 %1074 }
 0x2a9   :  { %1098 = vmatpush.msrb.mxu3 %v1038_v23  ;;  %v1057_v1 = vmax.f32 %v2106_v3, 0.0 }
 0x2aa   :  { %1099 = vmatmul.f32.vlgmr.msrb.gmra.mxu3 %v1079_v29 }
 0x2ab   :  { %1103 = vmatpush.msra.mxu3 %v1069_v13 }
 0x2ad   :  { %1104 = vmatpush.msra.mxu3 %v1068_v7  ;;  %v904_v28 = vpop.f32.mrf.mxu1 }
 0x2ae   :  { %v1002_v6 = vpop.f32.mrf.mxu2  ;;  %v905_v32 = vadd.f32 %v904_v28, %v2139_v44 }
 0x2af   :  { %v1003_v22 = vadd.f32 %v1002_v6, %v890_v27  ;;  %1105 = vmatpush.msra.mxu3 %v1067_v14 }
 0x2b1   :  { %1106 = vmatpush.msra.mxu3 %v1066_v11  ;;  %v1058_v53 = vmax.f32 %v1003_v22, 0.0 }
 0x2b5   :  { %v907_v63 = vpop.f32.mrf.mxu1 }
 0x2b6   :  { %v1005_v37 = vpop.f32.mrf.mxu2  ;;  %v908_v0 = vadd.f32 %v907_v63, %v1982_v4 }
 0x2bd   :  { %v910_v25 = vpop.f32.mrf.mxu1 }
 0x2be   :  { %v1008_v39 = vpop.f32.mrf.mxu2  ;;  %v911_v10 = vadd.f32 %v910_v25, %v1994_v21  ;;  %v2142_v21 = vld [vmem:[#allocation5_spill] sm:$0xff] }
 0x2bf   :  { %v893_v52 = vadd.f32 %v892_v57, %v2142_v21  ;;  %v1009_v18 = vadd.f32 %v1008_v39, %v896_v41 }
 0x2c1   :  { %v1006_v8 = vadd.f32 %v1005_v37, %v893_v52  ;;  %v1060_v56 = vmax.f32 %v1009_v18, 0.0 }
 0x2c3   :  { %v1059_v30 = vmax.f32 %v1006_v8, 0.0 }
 0x2c6   :  { %v1011_v61 = vpop.f32.mrf.mxu2 }
 0x2c7   :  { %v1012_v59 = vadd.f32 %v1011_v61, %v899_v17 }
 0x2c9   :  { %v1061_v40 = vmax.f32 %v1012_v59, 0.0 }
 0x2ce   :  { %v1014_v19 = vpop.f32.mrf.mxu2 }
 0x2cf   :  { %v1015_v62 = vadd.f32 %v1014_v19, %v902_v60 }
 0x2d1   :  { %v1062_v54 = vmax.f32 %v1015_v62, 0.0 }
 0x2d6   :  { %v1017_v51 = vpop.f32.mrf.mxu2 }
 0x2d7   :  { %v1018_v15 = vadd.f32 %v1017_v51, %v905_v32 }
 0x2d9   :  { %v1063_v4 = vmax.f32 %v1018_v15, 0.0 }
 0x2de   :  { %v1020_v2 = vpop.f32.mrf.mxu2 }
 0x2df   :  { %v1021_v33 = vadd.f32 %v1020_v2, %v908_v0 }
 0x2e1   :  { %v1064_v49 = vmax.f32 %v1021_v33, 0.0 }
 0x2e6   :  { %v1023_v58 = vpop.f32.mrf.mxu2 }
 0x2e7   :  { %v1024_v24 = vadd.f32 %v1023_v58, %v911_v10 }
 0x2e9   :  { %v1065_v5 = vmax.f32 %v1024_v24, 0.0 }
 0x2eb   :  { %1107 = vmatpush.msra.mxu3 %v1065_v5 }
 0x2ed   :  { %1108 = vmatpush.msra.mxu3 %v1064_v49 }
 0x2ef   :  { %1109 = vmatpush.msra.mxu3 %v1063_v4 }
 0x2f1   :  { %1110 = vmatpush.msra.mxu3 %v1062_v54 }
 0x2f3   :  { %1111 = vmatpush.msra.mxu3 %v1061_v40 }
 0x2f5   :  { %1112 = vmatpush.msra.mxu3 %v1060_v56 }
 0x2f7   :  { %1113 = vmatpush.msra.mxu3 %v1059_v30 }
 0x2f9   :  { %1114 = vmatpush.msra.mxu3 %v1058_v53 }
 0x2fb   :  { %1115 = vmatpush.msra.mxu3 %v1057_v1 }
 0x2fd   :  { %1116 = vmatpush.msra.mxu3 %v1056_v20 }
 0x2ff   :  { %1117 = vmatpush.msra.mxu3 %v1055_v34 }
 0x301   :  { %1118 = vmatpush.msra.mxu3 %v1054_v42 }
 0x302   :  { %1119 = vmatmul.f32.vlgmr.msra.gmra.mxu3 %v1080_v47 }
 0x32d   :  { %v1100_v57 = vpop.f32.mrf.mxu3 }
 0x32e   :  { %v1101_v36 = vadd.f32 %v1100_v57, %v1075_v43 }
 0x385   :  { %v1120_v23 = vpop.f32.mrf.mxu3 }
 0x386   :  { %v1121_v48 = vadd.f32 %v1120_v23, %v1101_v36 }
 0x388   :  { %1123 = vst [vmem:[%s2134_s7] sm:$0xf] %v1121_v48 }

</bundles_post_ra>
